<compile_context>
chip_gen: v6e
topology: v6e:2x2x1
jax: 0.10.0
libtpu: 0.0.40
codegen_flags: <defaults>
</compile_context>

<pallas_src>
import jax
import jax.numpy as jnp
from jax import lax
from jax.experimental import pallas as pl
from jax.experimental.pallas import tpu as pltpu


def _round_up(x, m):
    return ((x + m - 1) // m) * m


def actor_kernel_abs(x_ref, w_ref, o_ref):
    # |W| on the VPU; contraction over state_dim fed straight to the MXU with
    # f32 accumulation (no transposed copy of |W|).
    w_abs = jnp.abs(w_ref[...])                      # (A, S)
    o_ref[...] = lax.dot_general(
        x_ref[...],                                  # (B, S)
        w_abs,                                       # (A, S)
        dimension_numbers=(((1,), (1,)), ((), ())),  # contract over state_dim
        preferred_element_type=jnp.float32,
    ).astype(o_ref.dtype)                            # (B, A)


def actor_kernel_matmul(x_ref, w_abs_ref, o_ref):
    # |W| already precomputed in the wrapper (amortized over the whole grid).
    o_ref[...] = lax.dot_general(
        x_ref[...],                                  # (tile_b, S)
        w_abs_ref[...],                              # (A, S)
        dimension_numbers=(((1,), (1,)), ((), ())),  # contract over state_dim
        preferred_element_type=jnp.float32,
    ).astype(o_ref.dtype)                            # (tile_b, A)


def _cost(B, S, A):
    return pl.CostEstimate(
        flops=2 * B * S * A,
        transcendentals=0,
        bytes_accessed=4 * (B * S + A * S + B * A),
    )


def _actor_forward_small(x, w):
    """Whole problem fits VMEM: gridless call, no pipeline machinery."""
    B, S = x.shape
    A, S2 = w.shape
    assert S == S2, "state_dim mismatch"
    return pl.pallas_call(
        actor_kernel_abs,
        out_shape=jax.ShapeDtypeStruct((B, A), x.dtype),
        in_specs=[
            pl.BlockSpec(memory_space=pltpu.MemorySpace.VMEM),
            pl.BlockSpec(memory_space=pltpu.MemorySpace.VMEM),
        ],
        out_specs=pl.BlockSpec(memory_space=pltpu.MemorySpace.VMEM),
        cost_estimate=_cost(B, S, A),
    )(x, w)


def _choose_tile_b(B, S, A, *, vmem_budget_bytes=24 << 20):
    """Largest batch tile fitting the VMEM budget, with a >=2-step (ideally
    even) grid so dimension_semantics=('parallel',) can shard across both
    v7x TensorCores."""
    bytes_per_row = 2 * (S + A) * 4          # double-buffered x + out tiles (f32)
    w_bytes = 2 * A * S * 4                  # resident |W| (still 2 buffers)
    max_tile = max(8, (vmem_budget_bytes - w_bytes) // bytes_per_row)
    max_tile = max(8, (max_tile // 8) * 8)   # sublane-aligned

    tile_b = min(max_tile, _round_up(pl.cdiv(B, 2), 8))
    grid = pl.cdiv(B, tile_b)
    if grid > 2 and grid % 2 == 1:           # prefer even step count (TC balance)
        tile_b = min(max_tile, _round_up(pl.cdiv(B, grid + 1), 8))
    return max(8, tile_b)


def _actor_forward_tiled(x, w):
    """Large batch: tile over batch with |W| resident; no wrapper pad/slice."""
    B, S = x.shape
    A, S2 = w.shape
    assert S == S2, "state_dim mismatch"

    tile_b = _choose_tile_b(B, S, A)
    grid = (pl.cdiv(B, tile_b),)             # ragged last block handled by Pallas

    w_abs = jnp.abs(w)                       # hoisted once; reused by every tile

    return pl.pallas_call(
        actor_kernel_matmul,
        out_shape=jax.ShapeDtypeStruct((B, A), x.dtype),
        grid=grid,
        in_specs=[
            pl.BlockSpec((tile_b, S), lambda i: (i, 0)),  # stream x over batch
            pl.BlockSpec((A, S), lambda i: (0, 0)),       # |W| stays resident
        ],
        # Output block last dim == full array dim (A): no padded writeback.
        out_specs=pl.BlockSpec((tile_b, A), lambda i: (i, 0)),
        compiler_params=pltpu.CompilerParams(
            # batch tiles are independent -> sharded across TCs on v7x.
            dimension_semantics=("parallel",),
            # explicit limit: > v5e's 16 MiB scoped default, < v7x's 64 MiB/TC.
            vmem_limit_bytes=32 * 1024 * 1024,
        ),
        cost_estimate=_cost(B, S, A),
    )(x, w_abs)


def actor_forward(x, w):
    """x: (B, state_dim), w: (action_dim, state_dim) -> (B, action_dim).

    For deployed shapes (B<=512, S=32, A=16) plain `x @ jnp.abs(w).T` under XLA
    is equally fast (the op is launch-overhead bound); the Pallas paths exist
    for fusion/scaling.
    """
    if x.shape[0] <= 256:
        return _actor_forward_small(x, w)
    return _actor_forward_tiled(x, w)


if __name__ == "__main__":
    # Deterministic synthetic parameters / inputs (no checkpoint loading).
    state_dim = 32
    action_dim = 16

    key = jax.random.PRNGKey(0)
    k_x, k_w, k_xb = jax.random.split(key, 3)

    # Matches nn.Parameter(torch.randn(output_size, input_size)) shape.
    w = jax.random.normal(k_w, (action_dim, state_dim), dtype=jnp.float32)

    # --- small path (gridless, whole arrays in VMEM) ---
    batch = 8
    x = jax.random.normal(k_x, (batch, state_dim), dtype=jnp.float32)
    out = jax.block_until_ready(actor_forward(x, w))
    ref = x @ jnp.abs(w).T
    assert out.shape == (batch, action_dim)
    assert jnp.allclose(out, ref, atol=1e-5, rtol=1e-5)

    # --- tiled path (parallel grid over batch, |W| resident, ragged last block) ---
    big_batch = 1000          # not a multiple of the chosen tile -> exercises raggedness
    xb = jax.random.normal(k_xb, (big_batch, state_dim), dtype=jnp.float32)
    out_b = jax.block_until_ready(actor_forward(xb, w))
    ref_b = xb @ jnp.abs(w).T
    assert out_b.shape == (big_batch, action_dim)
    assert jnp.allclose(out_b, ref_b, atol=1e-5, rtol=1e-5)

    print("KERNEL_OK")
</pallas_src>

<mosaic_0001>
module attributes {stable_mosaic.version = 11 : i64} {
  func.func @actor_kernel_abs(%arg0: memref<8x32xf32, #tpu.memory_space<vmem>>, %arg1: memref<16x32xf32, #tpu.memory_space<vmem>>, %arg2: memref<8x16xf32, #tpu.memory_space<vmem>>) attributes {dimension_semantics = [], scalar_prefetch = 0 : i64, scratch_operands = 0 : i64, tpu.core_type = #tpu.core_type<tc>} {
    %c0 = arith.constant 0 : index
    %c0_0 = arith.constant 0 : index
    %0 = vector.load %arg1[%c0, %c0_0] : memref<16x32xf32, #tpu.memory_space<vmem>>, vector<16x32xf32>
    %1 = math.absf %0 : vector<16x32xf32>
    %c0_1 = arith.constant 0 : index
    %c0_2 = arith.constant 0 : index
    %2 = vector.load %arg0[%c0_1, %c0_2] : memref<8x32xf32, #tpu.memory_space<vmem>>, vector<8x32xf32>
    %cst = arith.constant dense<0.000000e+00> : vector<8x16xf32>
    %3 = tpu.matmul %2, %1, %cst {dimension_numbers = #tpu.dot_dimension_numbers<[1], [1], [0], [0], [0, 0, 1, 0], [], []>} : vector<8x32xf32>, vector<16x32xf32>, vector<8x16xf32> -> vector<8x16xf32>
    %c0_3 = arith.constant 0 : index
    %c0_4 = arith.constant 0 : index
    %4 = vector.load %arg2[%c0_3, %c0_4] : memref<8x16xf32, #tpu.memory_space<vmem>>, vector<8x16xf32>
    tpu.vector_store %arg2[%c0_3, %c0_4], %3 {strides = array<i32>} : memref<8x16xf32, #tpu.memory_space<vmem>>, vector<8x16xf32>,
    return
  }
}

</mosaic_0001>

<bundles_post_ra>
// kernel: tpu_custom_call.1
= control target key start
LH: loop header
LB: loop body
LE: loop exit
PB: predicated region body
PF: predicated region fallthrough
CT: control target
= control target key end

     0   :  { %7 = vsyncpa [#allocation3], 0  ;;  %s258_s0 = inlined_call_operand.hbm [shape: f32[8,32], index: 0, kind: input, shape index: {}]   ;;  %s259_s1 = inlined_call_operand.hbm [shape: f32[16,32], index: 1, kind: input, shape index: {}]   ;;  %s260_s2 = inlined_call_operand.hbm [shape: f32[8,16], index: 2, kind: output, shape index: {}]  }
   0x1   :  { %8 = vsyncpa [#allocation6], 0 }
   0x2   :  { %9 = vsyncpa [#allocation4], 0  ;;  %s227_s9 = smov [#allocation2]   ;;  %s228_s11 = smov [#allocation5]  }
   0x3   :  { %s16_s10 = sshll.u32 %s227_s9, 4  ;;  %s25_s12 = sshll.u32 %s228_s11, 4  ;;  %s17_s10 = int_to_ptr.vmem [resolvable:$true] %s16_s10  ;;  %s26_s12 = int_to_ptr.vmem [resolvable:$true] %s25_s12 }
   0x4   :  { %s169_s13 = scalar_lea.vmem %s17_s10, 128  ;;  %p174_p1 = scmp.lt.s32.totalorder %s17_s10, %s17_s10 }
   0x5   :  { %p170_p0 = scmp.ne.s32.totalorder %s17_s10, %s169_s13  ;;  %p175_p2 = scmp.lt.s32.totalorder %s169_s13, %s169_s13 }
   0x7   :  { %p176_p3 = por %p175_p2, %p174_p1 }
   0x9   :  { %p177_p4 = pnand %p176_p3, %p170_p0 }
   0xb   :  { %180 = shalt.err (!%p177_p4)
}
   0xc   :  { %19 = dma.hbm_to_vmem [thread:$0]  %s258_s0, 128, %s17_s10, [#allocation3]  }
   0xd   :  { %s189_s16 = scalar_lea.vmem %s26_s12, 256  ;;  %p194_p6 = scmp.lt.s32.totalorder %s26_s12, %s26_s12 }
   0xe   :  { %p190_p5 = scmp.ne.s32.totalorder %s26_s12, %s189_s16  ;;  %p195_p7 = scmp.lt.s32.totalorder %s189_s16, %s189_s16 }
  0x10   :  { %p196_p8 = por %p195_p7, %p194_p6 }
  0x12   :  { %p197_p9 = pnand %p196_p8, %p190_p5 }
  0x14   :  { %200 = shalt.err (!%p197_p9)
}
  0x15   :  { %s229_s17 = smov 128   ;;  %s230_s18 = smov 8  }
  0x16   :  { %31 = dma.hbm_to_vmem [thread:$0]  %s259_s1, 256, %s26_s12, [#allocation6], %s229_s17, %s229_s17, %s230_s18  }
  0x17   :  { %221 = dma.done.wait [#allocation3], 128  }
  0x18   :  { %222 = vsyncadd [#allocation3], 4294967168 }
  0x19   :  { %223 = dma.done.wait [#allocation6], 256  }
  0x1a   :  { %224 = vsyncadd [#allocation6], 4294967040  ;;  %v231_v0 = vmov 0.0   ;;  %vm232_vm0 = vmmov 0   ;;  %v39_v1 = vld [vmem:[#allocation5 + $0x8] sm:$0xff]  ;;  %vm43_vm1 = vcmask 261120  }
  0x1b   :  { %147 = vmatprep.subr.mxu0 %v231_v0  ;;  %151 = vmatprep.mubr.msk.f32.mxu0 %vm232_vm0, %v231_v0  ;;  %v38_v2 = vld [vmem:[#allocation5] sm:$0xff]  ;;  %v41_v3 = vand.u32 2147483647, %v39_v1  ;;  %v42_v5 = vld [vmem:[#allocation2] sm:$0xff]  ;;  %s233_s0 = smov [#allocation7]   ;;  %vm123_vm2 = vcmask 130048  }
  0x1c   :  { %v40_v4 = vand.u32 2147483647, %v38_v2  ;;  %s131_s1 = sshll.u32 %s233_s0, 4  ;;  %s132_s1 = int_to_ptr.vmem [resolvable:$true] %s131_s1 }
  0x1d   :  { %148 = vmatpush3.xpose.msk.msra.mxu0 %vm43_vm1, %v41_v3  ;;  %s201_s21 = scalar_lea.vmem %s132_s1, 128  ;;  %p206_p11 = scmp.lt.s32.totalorder %s132_s1, %s132_s1 }
  0x1e   :  { %149 = vmatprep.subr.mxu0 %v231_v0  ;;  %p202_p10 = scmp.ne.s32.totalorder %s132_s1, %s201_s21  ;;  %p207_p12 = scmp.lt.s32.totalorder %s201_s21, %s201_s21 }
  0x20   :  { %p208_p13 = por %p207_p12, %p206_p11 }
  0x21   :  { %150 = vmatpush3.xpose.msk.msra.mxu0 %vm43_vm1, %v40_v4 }
  0x22   :  { %p209_p0 = pnand %p208_p13, %p202_p10 }
  0x24   :  { %152 = vmatmul.mubr.msk.f32.vlgmr.msra.gmra.mxu0 %vm43_vm1, %v42_v5 }
  0xe4   :  { %v119_v6 = vpop.f32.mrf.mxu0 }
  0xe5   :  { %124 = vst.msk [vmem:[#allocation7] sm:$0xff] %vm123_vm2, %v119_v6 }
  0xe6   :  { %v153_v7 = vpop.f32.mrf.mxu0 }
  0xe7   :  { %212 = shalt.err (!%p209_p0)
}
  0xe8   :  { %134 = dma.vmem_to_hbm [thread:$0]  %s132_s1, 128, %s260_s2, [#allocation4]  }
  0xe9   :  { %225 = dma.done.wait [#allocation4], 128  }
  0xea   :  { %226 = vsyncadd [#allocation4], 4294967168 }
  0xeb   :  { %138 = vsyncpa [#allocation3], 1 }
  0xec   :  { %139 = vsyncpa [#allocation6], 1 }
  0xed   :  { %140 = vsyncpa [#allocation4], 1 }

</bundles_post_ra>
